<compile_context>
chip_gen: v6e
topology: v6e:2x2x1
jax: 0.10.0
libtpu: 0.0.40
codegen_flags: <defaults>
</compile_context>

<pallas_src>
import jax
import jax.numpy as jnp
from jax.scipy.linalg import block_diag
from jax.experimental import pallas as pl
from jax.experimental.pallas import tpu as pltpu

NUM_LAYERS = 2          # num_layers in the PyTorch module
BN_EPS = 1e-5           # PyTorch BatchNorm1d default eps
MASK_EPS = 1e-10        # epsilon from the module's forward
GUMBEL_EPS = 1e-20      # eps inside sample_gumbel


def _softmax_last(x):
    m = jnp.max(x, axis=-1, keepdims=True)
    e = jnp.exp(x - m)
    return e / jnp.sum(e, axis=-1, keepdims=True)


def fused_kernel(inv_tau_ref,                                   # SMEM (1,1) f32
                 x_ref, mask_ref, u_ref,                        # activations [B,4E],[B,3C],[B,3C]
                 w0_ref, b0_ref, wu_ref, bu_ref,                # fused shared / unique weights
                 wout_ref, bout_ref, f_ref,                     # output layer + F matrices
                 vhat_p_ref, d_p_ref, g_p_ref,                  # per-view outputs
                 vhat_a0_ref, d_a0_ref, g_a0_ref,
                 vhat_a1_ref, d_a1_ref, g_a1_ref):
    inv_tau = inv_tau_ref[0, 0]
    C = d_p_ref.shape[-1]

    # --- shared FF for all 3 views in one matmul (BN folded, dropout=identity) ---
    h = (jnp.dot(x_ref[...], w0_ref[...], preferred_element_type=jnp.float32)
         + b0_ref[...])
    h = jnp.maximum(h, 0.0)                                      # ReLU

    # --- unique FFs, block-diagonal over views: one matmul per layer ---
    for i in range(wu_ref.shape[0]):
        h = (jnp.dot(h, wu_ref[i], preferred_element_type=jnp.float32)
             + bu_ref[i])
        h = jnp.maximum(h, 0.0)

    logits = (jnp.dot(h, wout_ref[...], preferred_element_type=jnp.float32)
              + bout_ref[...])                                   # [B, 3C]

    # --- mask logits, add epsilon where masked out ---
    mask = mask_ref[...]                                         # [B, 3C]
    logits = logits * mask + (1.0 - mask) * MASK_EPS

    # --- Gumbel(0,1) noise from provided uniform draws ---
    gumbel = -jnp.log(-jnp.log(u_ref[...] + GUMBEL_EPS) + GUMBEL_EPS)

    out_refs = ((vhat_p_ref, d_p_ref, g_p_ref),
                (vhat_a0_ref, d_a0_ref, g_a0_ref),
                (vhat_a1_ref, d_a1_ref, g_a1_ref))
    for v, (vhat_ref, d_ref, g_ref) in enumerate(out_refs):
        lo = v * C
        lg = logits[:, lo:lo + C]
        mk = mask[:, lo:lo + C]
        # d = softmax(logits) * mask   (class-dim softmax, per view)
        d = _softmax_last(lg) * mk
        # g = gumbel_softmax_sample(d, tau) * mask   (soft, log=False)
        g = _softmax_last((d + gumbel[:, lo:lo + C]) * inv_tau) * mk
        # vhat = g @ F   (extra *mask is redundant: g == 0 on masked rows)
        vhat = jnp.dot(g, f_ref[v], preferred_element_type=jnp.float32)
        d_ref[...] = d
        g_ref[...] = g
        vhat_ref[...] = vhat


# ------------------------- host-side parameter prep -------------------------
def _fold_bn(w, b, bn):
    """Fold eval-mode BatchNorm1d into the preceding Linear (w: [in,out])."""
    gamma, beta, mean, var = bn[0], bn[1], bn[2], bn[3]
    scale = gamma * jax.lax.rsqrt(var + BN_EPS)
    return w * scale[None, :], (b - mean) * scale + beta


def prepare_inference_params(params):
    """BN folding + block-diagonal / replicated weight assembly. Call once."""
    w_sh, b_sh = _fold_bn(params['shared']['w'], params['shared']['b'],
                          params['shared']['bn'])
    two_e, H = w_sh.shape
    E = two_e // 2
    C = params['p']['w_out'].shape[1]
    w_sh_v, w_sh_s = w_sh[:E], w_sh[E:]
    Z = jnp.zeros((E, H), jnp.float32)
    # W0 maps x_cat = [v_p | v_a0 | v_a1 | v_sentence]  ->  [h_p | h_a0 | h_a1]
    w0 = jnp.concatenate([
        jnp.concatenate([w_sh_v, Z, Z], axis=1),
        jnp.concatenate([Z, w_sh_v, Z], axis=1),
        jnp.concatenate([Z, Z, w_sh_v], axis=1),
        jnp.concatenate([w_sh_s, w_sh_s, w_sh_s], axis=1),
    ], axis=0).astype(jnp.float32)                               # [4E, 3H]
    b0 = jnp.tile(b_sh.reshape(1, -1), (1, 3)).astype(jnp.float32)   # [1, 3H]

    views = ('p', 'a0', 'a1')
    w_u_bd, b_u_cat = [], []
    for i in range(NUM_LAYERS):
        ws, bs = [], []
        for name in views:
            v = params[name]
            w_i, b_i = _fold_bn(v['w_u'][i], v['b_u'][i], v['bn_u'][i])
            ws.append(w_i)
            bs.append(b_i)
        w_u_bd.append(block_diag(*ws))                           # [3H, 3H]
        b_u_cat.append(jnp.concatenate(bs).reshape(1, -1))       # [1, 3H]

    prep = {
        'w0': w0, 'b0': b0,
        'w_u': jnp.stack(w_u_bd).astype(jnp.float32),            # [L, 3H, 3H]
        'b_u': jnp.stack(b_u_cat).astype(jnp.float32),           # [L, 1, 3H]
        'w_out': block_diag(*[params[n]['w_out'] for n in views]).astype(jnp.float32),  # [3H, 3C]
        'b_out': jnp.concatenate([params[n]['b_out'] for n in views]).reshape(1, -1).astype(jnp.float32),  # [1, 3C]
        'F': jnp.stack([params[n]['F'] for n in views]).astype(jnp.float32),            # [3, C, E]
        'F_list': tuple(params[n]['F'].astype(jnp.float32) for n in views),
        'dims': (E, H, C),
    }
    return prep


# ------------------------------- forward pass -------------------------------
def combined_autoencoder_forward(v_p, v_a0, v_a1, mask_p, mask_a0, mask_a1,
                                 v_sentence, tau, prep, noise):
    E, H, C = prep['dims']
    B = v_p.shape[0]

    x_cat = jnp.concatenate([v_p, v_a0, v_a1, v_sentence], axis=-1).astype(jnp.float32)      # [B, 4E]
    mask_all = jnp.concatenate(
        [jnp.broadcast_to(m.astype(jnp.float32)[:, None], (B, C))
         for m in (mask_p, mask_a0, mask_a1)], axis=-1)                                      # [B, 3C]
    u_all = jnp.concatenate([noise['p'], noise['a0'], noise['a1']],
                            axis=-1).astype(jnp.float32)                                     # [B, 3C]
    inv_tau = jnp.reshape(jnp.asarray(1.0 / tau, jnp.float32), (1, 1))

    # Advisory cost estimate (tiny, latency-bound custom call).
    flops = int(2 * B * (4 * E * 3 * H
                         + NUM_LAYERS * (3 * H) * (3 * H)
                         + (3 * H) * (3 * C)
                         + 3 * C * E))
    transcendentals = int(12 * B * C)                     # exp + log in softmax/gumbel
    in_bytes = 4 * (B * 4 * E + 2 * B * 3 * C + 4 * E * 3 * H + 3 * H
                    + NUM_LAYERS * (9 * H * H + 3 * H) + 3 * H * 3 * C + 3 * C
                    + 3 * C * E) + 4
    out_bytes = 4 * 3 * B * (E + 2 * C)
    cost = pl.CostEstimate(flops=flops, transcendentals=transcendentals,
                           bytes_accessed=int(in_bytes + out_bytes))

    vmem = pl.BlockSpec(memory_space=pltpu.MemorySpace.VMEM)
    smem = pl.BlockSpec(memory_space=pltpu.MemorySpace.SMEM)
    out_shapes = tuple(jax.ShapeDtypeStruct(s, jnp.float32)
                       for s in ((B, E), (B, C), (B, C)) * 3)

    outs = pl.pallas_call(
        fused_kernel,
        out_shape=out_shapes,
        in_specs=[smem] + [vmem] * 10,
        out_specs=tuple([vmem] * 9),
        cost_estimate=cost,
    )(
        inv_tau, x_cat, mask_all, u_all,
        prep['w0'], prep['b0'], prep['w_u'], prep['b_u'],
        prep['w_out'], prep['b_out'], prep['F'],
    )

    out = {}
    for idx, name in enumerate(('p', 'a0', 'a1')):
        out[name] = {
            'vhat': outs[3 * idx],
            'd': outs[3 * idx + 1],
            'g': outs[3 * idx + 2],
            'F': prep['F_list'][idx],
        }
    return out


# ---------------------------- parameter init --------------------------------
def xavier_uniform(key, shape, gain):
    fan_in, fan_out = shape
    bound = gain * (6.0 / (fan_in + fan_out)) ** 0.5
    return jax.random.uniform(key, shape, jnp.float32, -bound, bound)


def init_params(key, embedding_dim, hidden_dim, num_classes):
    gain = 2.0 ** 0.5                      # nn.init.calculate_gain('relu')
    keys = iter(jax.random.split(key, 32))
    # bn rows: gamma, beta, running_mean, running_var (fresh BatchNorm1d init)
    bn_default = jnp.stack([jnp.ones(hidden_dim), jnp.zeros(hidden_dim),
                            jnp.zeros(hidden_dim), jnp.ones(hidden_dim)]).astype(jnp.float32)
    params = {'shared': {
        'w': xavier_uniform(next(keys), (2 * embedding_dim, hidden_dim), gain),
        'b': jnp.zeros((hidden_dim,), jnp.float32),
        'bn': bn_default,
    }}
    for view in ('p', 'a0', 'a1'):
        w_u = jnp.stack([xavier_uniform(next(keys), (hidden_dim, hidden_dim), gain)
                         for _ in range(NUM_LAYERS)])
        params[view] = {
            'w_u': w_u,
            'b_u': jnp.zeros((NUM_LAYERS, hidden_dim), jnp.float32),
            'bn_u': jnp.stack([bn_default for _ in range(NUM_LAYERS)]),
            'w_out': xavier_uniform(next(keys), (hidden_dim, num_classes), gain),
            'b_out': jnp.zeros((num_classes,), jnp.float32),
            'F': xavier_uniform(next(keys), (num_classes, embedding_dim), gain),
        }
    return params


if __name__ == "__main__":
    B, E, H, C = 8, 32, 32, 8              # batch, embedding_dim, hidden_dim, num_classes
    key = jax.random.PRNGKey(0)
    k = jax.random.split(key, 12)

    v_p = jax.random.normal(k[0], (B, E), jnp.float32)
    v_a0 = jax.random.normal(k[1], (B, E), jnp.float32)
    v_a1 = jax.random.normal(k[2], (B, E), jnp.float32)
    v_sentence = jax.random.normal(k[3], (B, E), jnp.float32)
    mask_p = (jax.random.uniform(k[4], (B,)) > 0.2).astype(jnp.float32)
    mask_a0 = (jax.random.uniform(k[5], (B,)) > 0.2).astype(jnp.float32)
    mask_a1 = (jax.random.uniform(k[6], (B,)) > 0.2).astype(jnp.float32)
    # TODO(synk): torch.rand-based Gumbel sampling is replaced by deterministic
    # uniform noise provided as an input (kernel applies -log(-log(U+eps))+eps).
    noise = {'p': jax.random.uniform(k[7], (B, C), jnp.float32),
             'a0': jax.random.uniform(k[8], (B, C), jnp.float32),
             'a1': jax.random.uniform(k[9], (B, C), jnp.float32)}
    params = init_params(k[10], E, H, C)
    prep = prepare_inference_params(params)   # BN-fold / block-diag assembly, once
    tau = 1.0

    out = combined_autoencoder_forward(v_p, v_a0, v_a1, mask_p, mask_a0, mask_a1,
                                       v_sentence, tau, prep, noise)
    jax.block_until_ready(out)
    print("KERNEL_OK")
</pallas_src>

<mosaic_0001>
module attributes {stable_mosaic.version = 11 : i64} {
  func.func @fused_kernel(%arg0: memref<1x1xf32, #tpu.memory_space<smem>>, %arg1: memref<8x128xf32, #tpu.memory_space<vmem>>, %arg2: memref<8x24xf32, #tpu.memory_space<vmem>>, %arg3: memref<8x24xf32, #tpu.memory_space<vmem>>, %arg4: memref<128x96xf32, #tpu.memory_space<vmem>>, %arg5: memref<1x96xf32, #tpu.memory_space<vmem>>, %arg6: memref<2x96x96xf32, #tpu.memory_space<vmem>>, %arg7: memref<2x1x96xf32, #tpu.memory_space<vmem>>, %arg8: memref<96x24xf32, #tpu.memory_space<vmem>>, %arg9: memref<1x24xf32, #tpu.memory_space<vmem>>, %arg10: memref<3x8x32xf32, #tpu.memory_space<vmem>>, %arg11: memref<8x32xf32, #tpu.memory_space<vmem>>, %arg12: memref<8x8xf32, #tpu.memory_space<vmem>>, %arg13: memref<8x8xf32, #tpu.memory_space<vmem>>, %arg14: memref<8x32xf32, #tpu.memory_space<vmem>>, %arg15: memref<8x8xf32, #tpu.memory_space<vmem>>, %arg16: memref<8x8xf32, #tpu.memory_space<vmem>>, %arg17: memref<8x32xf32, #tpu.memory_space<vmem>>, %arg18: memref<8x8xf32, #tpu.memory_space<vmem>>, %arg19: memref<8x8xf32, #tpu.memory_space<vmem>>) attributes {dimension_semantics = [], scalar_prefetch = 0 : i64, scratch_operands = 0 : i64, tpu.core_type = #tpu.core_type<tc>} {
    %c0 = arith.constant 0 : index
    %c0_0 = arith.constant 0 : index
    %0 = memref.load %arg0[%c0, %c0_0] : memref<1x1xf32, #tpu.memory_space<smem>>
    %c0_1 = arith.constant 0 : index
    %c0_2 = arith.constant 0 : index
    %1 = vector.load %arg1[%c0_1, %c0_2] : memref<8x128xf32, #tpu.memory_space<vmem>>, vector<8x128xf32>
    %c0_3 = arith.constant 0 : index
    %c0_4 = arith.constant 0 : index
    %2 = vector.load %arg4[%c0_3, %c0_4] : memref<128x96xf32, #tpu.memory_space<vmem>>, vector<128x96xf32>
    %cst = arith.constant dense<0.000000e+00> : vector<8x96xf32>
    %3 = tpu.matmul %1, %2, %cst {dimension_numbers = #tpu.dot_dimension_numbers<[1], [0], [0], [1], [0, 0, 1, 1], [], []>} : vector<8x128xf32>, vector<128x96xf32>, vector<8x96xf32> -> vector<8x96xf32>
    %c0_5 = arith.constant 0 : index
    %c0_6 = arith.constant 0 : index
    %4 = vector.load %arg5[%c0_5, %c0_6] : memref<1x96xf32, #tpu.memory_space<vmem>>, vector<1x96xf32>
    %5 = vector.broadcast %4 : vector<1x96xf32> to vector<8x96xf32>
    %6 = arith.addf %3, %5 : vector<8x96xf32>
    %cst_7 = arith.constant 0.000000e+00 : f32
    %7 = vector.broadcast %cst_7 : f32 to vector<8x96xf32>
    %8 = arith.maximumf %6, %7 : vector<8x96xf32>
    %c0_8 = arith.constant 0 : index
    %c0_9 = arith.constant 0 : index
    %c0_10 = arith.constant 0 : index
    %9 = vector.load %arg6[%c0_8, %c0_9, %c0_10] : memref<2x96x96xf32, #tpu.memory_space<vmem>>, vector<1x96x96xf32>
    %10 = vector.shape_cast %9 : vector<1x96x96xf32> to vector<96x96xf32>
    %cst_11 = arith.constant dense<0.000000e+00> : vector<8x96xf32>
    %11 = tpu.matmul %8, %10, %cst_11 {dimension_numbers = #tpu.dot_dimension_numbers<[1], [0], [0], [1], [0, 0, 1, 1], [], []>} : vector<8x96xf32>, vector<96x96xf32>, vector<8x96xf32> -> vector<8x96xf32>
    %c0_12 = arith.constant 0 : index
    %c0_13 = arith.constant 0 : index
    %c0_14 = arith.constant 0 : index
    %12 = vector.load %arg7[%c0_12, %c0_13, %c0_14] : memref<2x1x96xf32, #tpu.memory_space<vmem>>, vector<1x1x96xf32>
    %13 = vector.shape_cast %12 : vector<1x1x96xf32> to vector<1x96xf32>
    %14 = vector.broadcast %13 : vector<1x96xf32> to vector<8x96xf32>
    %15 = arith.addf %11, %14 : vector<8x96xf32>
    %cst_15 = arith.constant 0.000000e+00 : f32
    %16 = vector.broadcast %cst_15 : f32 to vector<8x96xf32>
    %17 = arith.maximumf %15, %16 : vector<8x96xf32>
    %c1 = arith.constant 1 : index
    %c0_16 = arith.constant 0 : index
    %c0_17 = arith.constant 0 : index
    %18 = vector.load %arg6[%c1, %c0_16, %c0_17] : memref<2x96x96xf32, #tpu.memory_space<vmem>>, vector<1x96x96xf32>
    %19 = vector.shape_cast %18 : vector<1x96x96xf32> to vector<96x96xf32>
    %cst_18 = arith.constant dense<0.000000e+00> : vector<8x96xf32>
    %20 = tpu.matmul %17, %19, %cst_18 {dimension_numbers = #tpu.dot_dimension_numbers<[1], [0], [0], [1], [0, 0, 1, 1], [], []>} : vector<8x96xf32>, vector<96x96xf32>, vector<8x96xf32> -> vector<8x96xf32>
    %c1_19 = arith.constant 1 : index
    %c0_20 = arith.constant 0 : index
    %c0_21 = arith.constant 0 : index
    %21 = vector.load %arg7[%c1_19, %c0_20, %c0_21] : memref<2x1x96xf32, #tpu.memory_space<vmem>>, vector<1x1x96xf32>
    %22 = vector.shape_cast %21 : vector<1x1x96xf32> to vector<1x96xf32>
    %23 = vector.broadcast %22 : vector<1x96xf32> to vector<8x96xf32>
    %24 = arith.addf %20, %23 : vector<8x96xf32>
    %cst_22 = arith.constant 0.000000e+00 : f32
    %25 = vector.broadcast %cst_22 : f32 to vector<8x96xf32>
    %26 = arith.maximumf %24, %25 : vector<8x96xf32>
    %c0_23 = arith.constant 0 : index
    %c0_24 = arith.constant 0 : index
    %27 = vector.load %arg8[%c0_23, %c0_24] : memref<96x24xf32, #tpu.memory_space<vmem>>, vector<96x24xf32>
    %cst_25 = arith.constant dense<0.000000e+00> : vector<8x24xf32>
    %28 = tpu.matmul %26, %27, %cst_25 {dimension_numbers = #tpu.dot_dimension_numbers<[1], [0], [0], [1], [0, 0, 1, 1], [], []>} : vector<8x96xf32>, vector<96x24xf32>, vector<8x24xf32> -> vector<8x24xf32>
    %c0_26 = arith.constant 0 : index
    %c0_27 = arith.constant 0 : index
    %29 = vector.load %arg9[%c0_26, %c0_27] : memref<1x24xf32, #tpu.memory_space<vmem>>, vector<1x24xf32>
    %30 = vector.broadcast %29 : vector<1x24xf32> to vector<8x24xf32>
    %31 = arith.addf %28, %30 : vector<8x24xf32>
    %c0_28 = arith.constant 0 : index
    %c0_29 = arith.constant 0 : index
    %32 = vector.load %arg2[%c0_28, %c0_29] : memref<8x24xf32, #tpu.memory_space<vmem>>, vector<8x24xf32>
    %33 = arith.mulf %31, %32 : vector<8x24xf32>
    %cst_30 = arith.constant 1.000000e+00 : f32
    %34 = vector.broadcast %cst_30 : f32 to vector<8x24xf32>
    %35 = arith.subf %34, %32 : vector<8x24xf32>
    %cst_31 = arith.constant 1.000000e-10 : f32
    %36 = vector.broadcast %cst_31 : f32 to vector<8x24xf32>
    %37 = arith.mulf %35, %36 : vector<8x24xf32>
    %38 = arith.addf %33, %37 : vector<8x24xf32>
    %c0_32 = arith.constant 0 : index
    %c0_33 = arith.constant 0 : index
    %39 = vector.load %arg3[%c0_32, %c0_33] : memref<8x24xf32, #tpu.memory_space<vmem>>, vector<8x24xf32>
    %cst_34 = arith.constant 9.99999968E-21 : f32
    %40 = vector.broadcast %cst_34 : f32 to vector<8x24xf32>
    %41 = arith.addf %39, %40 : vector<8x24xf32>
    %42 = math.log %41 : vector<8x24xf32>
    %cst_35 = arith.constant 0.000000e+00 : f32
    %43 = vector.broadcast %cst_35 : f32 to vector<8x24xf32>
    %44 = arith.subf %43, %42 : vector<8x24xf32>
    %cst_36 = arith.constant 9.99999968E-21 : f32
    %45 = vector.broadcast %cst_36 : f32 to vector<8x24xf32>
    %46 = arith.addf %44, %45 : vector<8x24xf32>
    %47 = math.log %46 : vector<8x24xf32>
    %cst_37 = arith.constant 0.000000e+00 : f32
    %48 = vector.broadcast %cst_37 : f32 to vector<8x24xf32>
    %49 = arith.subf %48, %47 : vector<8x24xf32>
    %50 = vector.extract_strided_slice %38 {offsets = [0, 0], sizes = [8, 8], strides = [1, 1]} : vector<8x24xf32> to vector<8x8xf32>
    %51 = vector.extract_strided_slice %32 {offsets = [0, 0], sizes = [8, 8], strides = [1, 1]} : vector<8x24xf32> to vector<8x8xf32>
    %cst_38 = arith.constant dense<0xFF800000> : vector<8xf32>
    %52 = vector.multi_reduction <maximumf>, %50, %cst_38 [1] : vector<8x8xf32> to vector<8xf32>
    %53 = vector.shape_cast %52 : vector<8xf32> to vector<8x1xf32>
    %54 = vector.broadcast %53 : vector<8x1xf32> to vector<8x8xf32>
    %55 = arith.subf %50, %54 : vector<8x8xf32>
    %56 = math.exp %55 : vector<8x8xf32>
    %cst_39 = arith.constant dense<0.000000e+00> : vector<8xf32>
    %57 = vector.multi_reduction <add>, %56, %cst_39 [1] : vector<8x8xf32> to vector<8xf32>
    %58 = vector.shape_cast %57 : vector<8xf32> to vector<8x1xf32>
    %59 = vector.broadcast %58 : vector<8x1xf32> to vector<8x8xf32>
    %60 = arith.divf %56, %59 : vector<8x8xf32>
    %61 = arith.mulf %60, %51 : vector<8x8xf32>
    %62 = vector.extract_strided_slice %49 {offsets = [0, 0], sizes = [8, 8], strides = [1, 1]} : vector<8x24xf32> to vector<8x8xf32>
    %63 = arith.addf %61, %62 : vector<8x8xf32>
    %64 = vector.broadcast %0 : f32 to vector<8x8xf32>
    %65 = arith.mulf %63, %64 : vector<8x8xf32>
    %cst_40 = arith.constant dense<0xFF800000> : vector<8xf32>
    %66 = vector.multi_reduction <maximumf>, %65, %cst_40 [1] : vector<8x8xf32> to vector<8xf32>
    %67 = vector.shape_cast %66 : vector<8xf32> to vector<8x1xf32>
    %68 = vector.broadcast %67 : vector<8x1xf32> to vector<8x8xf32>
    %69 = arith.subf %65, %68 : vector<8x8xf32>
    %70 = math.exp %69 : vector<8x8xf32>
    %cst_41 = arith.constant dense<0.000000e+00> : vector<8xf32>
    %71 = vector.multi_reduction <add>, %70, %cst_41 [1] : vector<8x8xf32> to vector<8xf32>
    %72 = vector.shape_cast %71 : vector<8xf32> to vector<8x1xf32>
    %73 = vector.broadcast %72 : vector<8x1xf32> to vector<8x8xf32>
    %74 = arith.divf %70, %73 : vector<8x8xf32>
    %75 = arith.mulf %74, %51 : vector<8x8xf32>
    %c0_42 = arith.constant 0 : index
    %c0_43 = arith.constant 0 : index
    %c0_44 = arith.constant 0 : index
    %76 = vector.load %arg10[%c0_42, %c0_43, %c0_44] : memref<3x8x32xf32, #tpu.memory_space<vmem>>, vector<1x8x32xf32>
    %77 = vector.shape_cast %76 : vector<1x8x32xf32> to vector<8x32xf32>
    %cst_45 = arith.constant dense<0.000000e+00> : vector<8x32xf32>
    %78 = tpu.matmul %75, %77, %cst_45 {dimension_numbers = #tpu.dot_dimension_numbers<[1], [0], [0], [1], [0, 0, 1, 1], [], []>} : vector<8x8xf32>, vector<8x32xf32>, vector<8x32xf32> -> vector<8x32xf32>
    %c0_46 = arith.constant 0 : index
    %c0_47 = arith.constant 0 : index
    %79 = vector.load %arg12[%c0_46, %c0_47] : memref<8x8xf32, #tpu.memory_space<vmem>>, vector<8x8xf32>
    tpu.vector_store %arg12[%c0_46, %c0_47], %61 {strides = array<i32>} : memref<8x8xf32, #tpu.memory_space<vmem>>, vector<8x8xf32>,
    %c0_48 = arith.constant 0 : index
    %c0_49 = arith.constant 0 : index
    %80 = vector.load %arg13[%c0_48, %c0_49] : memref<8x8xf32, #tpu.memory_space<vmem>>, vector<8x8xf32>
    tpu.vector_store %arg13[%c0_48, %c0_49], %75 {strides = array<i32>} : memref<8x8xf32, #tpu.memory_space<vmem>>, vector<8x8xf32>,
    %c0_50 = arith.constant 0 : index
    %c0_51 = arith.constant 0 : index
    %81 = vector.load %arg11[%c0_50, %c0_51] : memref<8x32xf32, #tpu.memory_space<vmem>>, vector<8x32xf32>
    tpu.vector_store %arg11[%c0_50, %c0_51], %78 {strides = array<i32>} : memref<8x32xf32, #tpu.memory_space<vmem>>, vector<8x32xf32>,
    %82 = vector.extract_strided_slice %38 {offsets = [0, 8], sizes = [8, 8], strides = [1, 1]} : vector<8x24xf32> to vector<8x8xf32>
    %83 = vector.extract_strided_slice %32 {offsets = [0, 8], sizes = [8, 8], strides = [1, 1]} : vector<8x24xf32> to vector<8x8xf32>
    %cst_52 = arith.constant dense<0xFF800000> : vector<8xf32>
    %84 = vector.multi_reduction <maximumf>, %82, %cst_52 [1] : vector<8x8xf32> to vector<8xf32>
    %85 = vector.shape_cast %84 : vector<8xf32> to vector<8x1xf32>
    %86 = vector.broadcast %85 : vector<8x1xf32> to vector<8x8xf32>
    %87 = arith.subf %82, %86 : vector<8x8xf32>
    %88 = math.exp %87 : vector<8x8xf32>
    %cst_53 = arith.constant dense<0.000000e+00> : vector<8xf32>
    %89 = vector.multi_reduction <add>, %88, %cst_53 [1] : vector<8x8xf32> to vector<8xf32>
    %90 = vector.shape_cast %89 : vector<8xf32> to vector<8x1xf32>
    %91 = vector.broadcast %90 : vector<8x1xf32> to vector<8x8xf32>
    %92 = arith.divf %88, %91 : vector<8x8xf32>
    %93 = arith.mulf %92, %83 : vector<8x8xf32>
    %94 = vector.extract_strided_slice %49 {offsets = [0, 8], sizes = [8, 8], strides = [1, 1]} : vector<8x24xf32> to vector<8x8xf32>
    %95 = arith.addf %93, %94 : vector<8x8xf32>
    %96 = vector.broadcast %0 : f32 to vector<8x8xf32>
    %97 = arith.mulf %95, %96 : vector<8x8xf32>
    %cst_54 = arith.constant dense<0xFF800000> : vector<8xf32>
    %98 = vector.multi_reduction <maximumf>, %97, %cst_54 [1] : vector<8x8xf32> to vector<8xf32>
    %99 = vector.shape_cast %98 : vector<8xf32> to vector<8x1xf32>
    %100 = vector.broadcast %99 : vector<8x1xf32> to vector<8x8xf32>
    %101 = arith.subf %97, %100 : vector<8x8xf32>
    %102 = math.exp %101 : vector<8x8xf32>
    %cst_55 = arith.constant dense<0.000000e+00> : vector<8xf32>
    %103 = vector.multi_reduction <add>, %102, %cst_55 [1] : vector<8x8xf32> to vector<8xf32>
    %104 = vector.shape_cast %103 : vector<8xf32> to vector<8x1xf32>
    %105 = vector.broadcast %104 : vector<8x1xf32> to vector<8x8xf32>
    %106 = arith.divf %102, %105 : vector<8x8xf32>
    %107 = arith.mulf %106, %83 : vector<8x8xf32>
    %c1_56 = arith.constant 1 : index
    %c0_57 = arith.constant 0 : index
    %c0_58 = arith.constant 0 : index
    %108 = vector.load %arg10[%c1_56, %c0_57, %c0_58] : memref<3x8x32xf32, #tpu.memory_space<vmem>>, vector<1x8x32xf32>
    %109 = vector.shape_cast %108 : vector<1x8x32xf32> to vector<8x32xf32>
    %cst_59 = arith.constant dense<0.000000e+00> : vector<8x32xf32>
    %110 = tpu.matmul %107, %109, %cst_59 {dimension_numbers = #tpu.dot_dimension_numbers<[1], [0], [0], [1], [0, 0, 1, 1], [], []>} : vector<8x8xf32>, vector<8x32xf32>, vector<8x32xf32> -> vector<8x32xf32>
    %c0_60 = arith.constant 0 : index
    %c0_61 = arith.constant 0 : index
    %111 = vector.load %arg15[%c0_60, %c0_61] : memref<8x8xf32, #tpu.memory_space<vmem>>, vector<8x8xf32>
    tpu.vector_store %arg15[%c0_60, %c0_61], %93 {strides = array<i32>} : memref<8x8xf32, #tpu.memory_space<vmem>>, vector<8x8xf32>,
    %c0_62 = arith.constant 0 : index
    %c0_63 = arith.constant 0 : index
    %112 = vector.load %arg16[%c0_62, %c0_63] : memref<8x8xf32, #tpu.memory_space<vmem>>, vector<8x8xf32>
    tpu.vector_store %arg16[%c0_62, %c0_63], %107 {strides = array<i32>} : memref<8x8xf32, #tpu.memory_space<vmem>>, vector<8x8xf32>,
    %c0_64 = arith.constant 0 : index
    %c0_65 = arith.constant 0 : index
    %113 = vector.load %arg14[%c0_64, %c0_65] : memref<8x32xf32, #tpu.memory_space<vmem>>, vector<8x32xf32>
    tpu.vector_store %arg14[%c0_64, %c0_65], %110 {strides = array<i32>} : memref<8x32xf32, #tpu.memory_space<vmem>>, vector<8x32xf32>,
    %114 = vector.extract_strided_slice %38 {offsets = [0, 16], sizes = [8, 8], strides = [1, 1]} : vector<8x24xf32> to vector<8x8xf32>
    %115 = vector.extract_strided_slice %32 {offsets = [0, 16], sizes = [8, 8], strides = [1, 1]} : vector<8x24xf32> to vector<8x8xf32>
    %cst_66 = arith.constant dense<0xFF800000> : vector<8xf32>
    %116 = vector.multi_reduction <maximumf>, %114, %cst_66 [1] : vector<8x8xf32> to vector<8xf32>
    %117 = vector.shape_cast %116 : vector<8xf32> to vector<8x1xf32>
    %118 = vector.broadcast %117 : vector<8x1xf32> to vector<8x8xf32>
    %119 = arith.subf %114, %118 : vector<8x8xf32>
    %120 = math.exp %119 : vector<8x8xf32>
    %cst_67 = arith.constant dense<0.000000e+00> : vector<8xf32>
    %121 = vector.multi_reduction <add>, %120, %cst_67 [1] : vector<8x8xf32> to vector<8xf32>
    %122 = vector.shape_cast %121 : vector<8xf32> to vector<8x1xf32>
    %123 = vector.broadcast %122 : vector<8x1xf32> to vector<8x8xf32>
    %124 = arith.divf %120, %123 : vector<8x8xf32>
    %125 = arith.mulf %124, %115 : vector<8x8xf32>
    %126 = vector.extract_strided_slice %49 {offsets = [0, 16], sizes = [8, 8], strides = [1, 1]} : vector<8x24xf32> to vector<8x8xf32>
    %127 = arith.addf %125, %126 : vector<8x8xf32>
    %128 = vector.broadcast %0 : f32 to vector<8x8xf32>
    %129 = arith.mulf %127, %128 : vector<8x8xf32>
    %cst_68 = arith.constant dense<0xFF800000> : vector<8xf32>
    %130 = vector.multi_reduction <maximumf>, %129, %cst_68 [1] : vector<8x8xf32> to vector<8xf32>
    %131 = vector.shape_cast %130 : vector<8xf32> to vector<8x1xf32>
    %132 = vector.broadcast %131 : vector<8x1xf32> to vector<8x8xf32>
    %133 = arith.subf %129, %132 : vector<8x8xf32>
    %134 = math.exp %133 : vector<8x8xf32>
    %cst_69 = arith.constant dense<0.000000e+00> : vector<8xf32>
    %135 = vector.multi_reduction <add>, %134, %cst_69 [1] : vector<8x8xf32> to vector<8xf32>
    %136 = vector.shape_cast %135 : vector<8xf32> to vector<8x1xf32>
    %137 = vector.broadcast %136 : vector<8x1xf32> to vector<8x8xf32>
    %138 = arith.divf %134, %137 : vector<8x8xf32>
    %139 = arith.mulf %138, %115 : vector<8x8xf32>
    %c2 = arith.constant 2 : index
    %c0_70 = arith.constant 0 : index
    %c0_71 = arith.constant 0 : index
    %140 = vector.load %arg10[%c2, %c0_70, %c0_71] : memref<3x8x32xf32, #tpu.memory_space<vmem>>, vector<1x8x32xf32>
    %141 = vector.shape_cast %140 : vector<1x8x32xf32> to vector<8x32xf32>
    %cst_72 = arith.constant dense<0.000000e+00> : vector<8x32xf32>
    %142 = tpu.matmul %139, %141, %cst_72 {dimension_numbers = #tpu.dot_dimension_numbers<[1], [0], [0], [1], [0, 0, 1, 1], [], []>} : vector<8x8xf32>, vector<8x32xf32>, vector<8x32xf32> -> vector<8x32xf32>
    %c0_73 = arith.constant 0 : index
    %c0_74 = arith.constant 0 : index
    %143 = vector.load %arg18[%c0_73, %c0_74] : memref<8x8xf32, #tpu.memory_space<vmem>>, vector<8x8xf32>
    tpu.vector_store %arg18[%c0_73, %c0_74], %125 {strides = array<i32>} : memref<8x8xf32, #tpu.memory_space<vmem>>, vector<8x8xf32>,
    %c0_75 = arith.constant 0 : index
    %c0_76 = arith.constant 0 : index
    %144 = vector.load %arg19[%c0_75, %c0_76] : memref<8x8xf32, #tpu.memory_space<vmem>>, vector<8x8xf32>
    tpu.vector_store %arg19[%c0_75, %c0_76], %139 {strides = array<i32>} : memref<8x8xf32, #tpu.memory_space<vmem>>, vector<8x8xf32>,
    %c0_77 = arith.constant 0 : index
    %c0_78 = arith.constant 0 : index
    %145 = vector.load %arg17[%c0_77, %c0_78] : memref<8x32xf32, #tpu.memory_space<vmem>>, vector<8x32xf32>
    tpu.vector_store %arg17[%c0_77, %c0_78], %142 {strides = array<i32>} : memref<8x32xf32, #tpu.memory_space<vmem>>, vector<8x32xf32>,
    return
  }
}

</mosaic_0001>

<bundles_post_ra>
// kernel: tpu_custom_call.1
= control target key start
LH: loop header
LB: loop body
LE: loop exit
PB: predicated region body
PF: predicated region fallthrough
CT: control target
= control target key end

     0   :  { %s1808_s0 = inlined_call_operand.<no memory space> [shape: f32[1,1], index: 0, kind: input, shape index: {}]   ;;  %s1809_s1 = inlined_call_operand.vmem [shape: f32[8,128], index: 1, kind: input, shape index: {}]   ;;  %s1810_s2 = inlined_call_operand.vmem [shape: f32[8,24], index: 2, kind: input, shape index: {}]   ;;  %s1811_s3 = inlined_call_operand.vmem [shape: f32[8,24], index: 3, kind: input, shape index: {}]   ;;  %s1812_s4 = inlined_call_operand.vmem [shape: f32[128,96], index: 4, kind: input, shape index: {}]   ;;  %s1813_s5 = inlined_call_operand.vmem [shape: f32[1,96], index: 5, kind: input, shape index: {}]   ;;  %s1814_s6 = inlined_call_operand.vmem [shape: f32[2,96,96], index: 6, kind: input, shape index: {}]   ;;  %s1815_s7 = inlined_call_operand.vmem [shape: f32[2,1,96], index: 7, kind: input, shape index: {}]   ;;  %s1816_s8 = inlined_call_operand.vmem [shape: f32[96,24], index: 8, kind: input, shape index: {}]   ;;  %s1817_s9 = inlined_call_operand.vmem [shape: f32[1,24], index: 9, kind: input, shape index: {}]   ;;  %s1818_s10 = inlined_call_operand.vmem [shape: f32[3,8,32], index: 10, kind: input, shape index: {}]   ;;  %s1819_s11 = inlined_call_operand.hbm [shape: f32[8,32], index: 11, kind: output, shape index: {0}]   ;;  %s1820_s12 = inlined_call_operand.hbm [shape: f32[8,8], index: 12, kind: output, shape index: {1}]   ;;  %s1821_s13 = inlined_call_operand.hbm [shape: f32[8,8], index: 13, kind: output, shape index: {2}]   ;;  %s1822_s14 = inlined_call_operand.hbm [shape: f32[8,32], index: 14, kind: output, shape index: {3}]   ;;  %s1823_s15 = inlined_call_operand.hbm [shape: f32[8,8], index: 15, kind: output, shape index: {4}]   ;;  %s1824_s16 = inlined_call_operand.hbm [shape: f32[8,8], index: 16, kind: output, shape index: {5}]   ;;  %s1825_s17 = inlined_call_operand.hbm [shape: f32[8,32], index: 17, kind: output, shape index: {6}]   ;;  %s1826_s18 = inlined_call_operand.hbm [shape: f32[8,8], index: 18, kind: output, shape index: {7}]   ;;  %s1827_s19 = inlined_call_operand.hbm [shape: f32[8,8], index: 19, kind: output, shape index: {8}]  }
   0x1   :  { %1828 = sst [smem:[#allocation22_spill]] %s1808_s0 }
   0x2   :  { %1829 = sst [smem:[#allocation23_spill]] %s1809_s1 }
   0x3   :  { %1830 = sst [smem:[#allocation24_spill]] %s1810_s2 }
   0x4   :  { %1831 = sst [smem:[#allocation25_spill]] %s1811_s3 }
   0x5   :  { %26 = vsyncpa [#allocation4], 0 }
   0x6   :  { %27 = vsyncpa [#allocation6], 0 }
   0x7   :  { %28 = vsyncpa [#allocation9], 0 }
   0x8   :  { %29 = vsyncpa [#allocation12], 0  ;;  %v70_v0 = vld [vmem:[%s1812_s4 + $0x78] sm:$0xff]  ;;  %v1361_v1 = vmov 0.0   ;;  %v69_v2 = vld [vmem:[%s1812_s4 + $0x70] sm:$0xff]  ;;  %vm1362_vm0 = vmmov 0  }
   0x9   :  { %999 = vmatprep.subr.mxu0 %v1361_v1  ;;  %1031 = vmatprep.mubr.msk.f32.mxu0 %vm1362_vm0, %v1361_v1  ;;  %v68_v3 = vld [vmem:[%s1812_s4 + $0x68] sm:$0xff]  ;;  %v67_v4 = vld [vmem:[%s1812_s4 + $0x60] sm:$0xff]  ;;  %v160_v5 = vld [vmem:[%s1814_s6 + $0x58] sm:$0xff] }
   0xa   :  { %1000 = vmatpush3.msra.mxu0 %v70_v0  ;;  %1034 = vmatprep.subr.mxu1 %v1361_v1  ;;  %v159_v6 = vld [vmem:[%s1814_s6 + $0x50] sm:$0xff]  ;;  %v66_v7 = vld [vmem:[%s1812_s4 + $0x58] sm:$0xff]  ;;  %v158_v8 = vld [vmem:[%s1814_s6 + $0x48] sm:$0xff] }
   0xb   :  { %1001 = vmatprep.subr.mxu0 %v1361_v1  ;;  %1058 = vmatprep.mubr.msk.f32.mxu1 %vm1362_vm0, %v1361_v1  ;;  %v65_v9 = vld [vmem:[%s1812_s4 + $0x50] sm:$0xff]  ;;  %v157_v10 = vld [vmem:[%s1814_s6 + $0x40] sm:$0xff] }
   0xc   :  { %1002 = vmatpush3.msra.mxu0 %v69_v2  ;;  %1035 = vmatpush3.msra.mxu1 %v160_v5 }
   0xd   :  { %1003 = vmatprep.subr.mxu0 %v1361_v1  ;;  %1036 = vmatprep.subr.mxu1 %v1361_v1 }
   0xe   :  { %1004 = vmatpush3.msra.mxu0 %v68_v3  ;;  %1037 = vmatpush3.msra.mxu1 %v159_v6 }
   0xf   :  { %1005 = vmatprep.subr.mxu0 %v1361_v1  ;;  %1038 = vmatprep.subr.mxu1 %v1361_v1 }
  0x10   :  { %1006 = vmatpush3.msra.mxu0 %v67_v4 }
  0x11   :  { %1007 = vmatprep.subr.mxu0 %v1361_v1 }
  0x12   :  { %30 = vsyncpa [#allocation15], 0  ;;  %1008 = vmatpush3.msra.mxu0 %v66_v7  ;;  %1039 = vmatpush3.msra.mxu1 %v158_v8  ;;  %v64_v11 = vld [vmem:[%s1812_s4 + $0x48] sm:$0xff]  ;;  %v156_v12 = vld [vmem:[%s1814_s6 + $0x38] sm:$0xff]  ;;  %s1832_s23 = sld [smem:[#allocation23_spill]]  ;;  %vm168_vm1 = vcmask 785408  }
  0x13   :  { %1009 = vmatprep.subr.mxu0 %v1361_v1  ;;  %1040 = vmatprep.subr.mxu1 %v1361_v1  ;;  %v63_v13 = vld [vmem:[%s1812_s4 + $0x40] sm:$0xff]  ;;  %v155_v14 = vld [vmem:[%s1814_s6 + $0x30] sm:$0xff]  ;;  %v62_v15 = vld [vmem:[%s1812_s4 + $0x38] sm:$0xff]  ;;  %s1833_s30 = sld [smem:[#allocation24_spill]]  ;;  %vm550_vm2 = vcmask 130112   ;;  %vm670_vm3 = vcmask 195712  }
  0x14   :  { %1010 = vmatpush3.msra.mxu0 %v65_v9  ;;  %1041 = vmatpush3.msra.mxu1 %v157_v10  ;;  %v154_v16 = vld [vmem:[%s1814_s6 + $0x28] sm:$0xff]  ;;  %v61_v17 = vld [vmem:[%s1812_s4 + $0x30] sm:$0xff]  ;;  %v153_v18 = vld [vmem:[%s1814_s6 + $0x20] sm:$0xff]  ;;  %vm444_vm4 = vcmask 64512   ;;  %s1834_s1 = sld [smem:[#allocation25_spill]] }
  0x15   :  { %1011 = vmatprep.subr.mxu0 %v1361_v1  ;;  %1042 = vmatprep.subr.mxu1 %v1361_v1  ;;  %v60_v19 = vld [vmem:[%s1812_s4 + $0x28] sm:$0xff]  ;;  %v152_v20 = vld [vmem:[%s1814_s6 + $0x18] sm:$0xff]  ;;  %v59_v21 = vld [vmem:[%s1812_s4 + $0x20] sm:$0xff] }
  0x16   :  { %1012 = vmatpush3.msra.mxu0 %v64_v11  ;;  %1043 = vmatpush3.msra.mxu1 %v156_v12  ;;  %v58_v22 = vld [vmem:[%s1812_s4 + $0x18] sm:$0xff]  ;;  %v57_v23 = vld [vmem:[%s1812_s4 + $0x10] sm:$0xff]  ;;  %v56_v24 = vld [vmem:[%s1812_s4 + $0x8] sm:$0xff] }
  0x17   :  { %1013 = vmatprep.subr.mxu0 %v1361_v1  ;;  %1044 = vmatprep.subr.mxu1 %v1361_v1  ;;  %v55_v25 = vld [vmem:[%s1812_s4] sm:$0xff]  ;;  %v151_v27 = vld [vmem:[%s1814_s6 + $0x10] sm:$0xff]  ;;  %v150_v28 = vld [vmem:[%s1814_s6 + $0x8] sm:$0xff] }
  0x18   :  { %1014 = vmatpush3.msra.mxu0 %v63_v13  ;;  %1045 = vmatpush3.msra.mxu1 %v155_v14  ;;  %v54_v26 = vld [vmem:[%s1832_s23] sm:$0xff]  ;;  %v926_v35 = vld [vmem:[%s1814_s6 + $0xb8] sm:$0xff]  ;;  %v925_v36 = vld [vmem:[%s1814_s6 + $0xb0] sm:$0xff]  ;;  %s1835_s23 = sld [smem:[#allocation22_spill]] }
  0x19   :  { %1015 = vmatprep.subr.mxu0 %v1361_v1  ;;  %1046 = vmatprep.subr.mxu1 %v1361_v1  ;;  %v149_v29 = vld [vmem:[%s1814_s6] sm:$0xff]  ;;  %v924_v37 = vld [vmem:[%s1814_s6 + $0xa8] sm:$0xff]  ;;  %v922_v39 = vld [vmem:[%s1814_s6 + $0x98] sm:$0xff] }
  0x1a   :  { %1016 = vmatpush3.msra.mxu0 %v62_v15  ;;  %1047 = vmatpush3.msra.mxu1 %v154_v16  ;;  %v912_v30 = vld [vmem:[%s1813_s5] ss:$0 sm:$0xff]  ;;  %v921_v40 = vld [vmem:[%s1814_s6 + $0x90] sm:$0xff]  ;;  %v920_v41 = vld [vmem:[%s1814_s6 + $0x88] sm:$0xff] }
  0x1b   :  { %1017 = vmatprep.subr.mxu0 %v1361_v1  ;;  %1048 = vmatprep.subr.mxu1 %v1361_v1  ;;  %v923_v38 = vld [vmem:[%s1814_s6 + $0xa0] sm:$0xff]  ;;  %v918_v43 = vld [vmem:[%s1814_s6 + $0x78] sm:$0xff]  ;;  %v917_v44 = vld [vmem:[%s1814_s6 + $0x70] sm:$0xff] }
  0x1c   :  { %1018 = vmatpush3.msra.mxu0 %v61_v17  ;;  %1049 = vmatpush3.msra.mxu1 %v153_v18  ;;  %v919_v42 = vld [vmem:[%s1814_s6 + $0x80] sm:$0xff]  ;;  %v916_v45 = vld [vmem:[%s1814_s6 + $0x68] sm:$0xff]  ;;  %v349_v47 = vld [vmem:[%s1816_s8 + $0x58] sm:$0xff] }
  0x1d   :  { %1019 = vmatprep.subr.mxu0 %v1361_v1  ;;  %1050 = vmatprep.subr.mxu1 %v1361_v1  ;;  %v915_v46 = vld [vmem:[%s1814_s6 + $0x60] sm:$0xff]  ;;  %v348_v48 = vld [vmem:[%s1816_s8 + $0x50] sm:$0xff]  ;;  %v347_v49 = vld [vmem:[%s1816_s8 + $0x48] sm:$0xff] }
  0x1e   :  { %1020 = vmatpush3.msra.mxu0 %v60_v19  ;;  %1051 = vmatpush3.msra.mxu1 %v152_v20  ;;  %v346_v50 = vld [vmem:[%s1816_s8 + $0x40] sm:$0xff]  ;;  %v345_v51 = vld [vmem:[%s1816_s8 + $0x38] sm:$0xff]  ;;  %v344_v52 = vld [vmem:[%s1816_s8 + $0x30] sm:$0xff] }
  0x1f   :  { %1021 = vmatprep.subr.mxu0 %v1361_v1  ;;  %1052 = vmatprep.subr.mxu1 %v1361_v1  ;;  %v343_v53 = vld [vmem:[%s1816_s8 + $0x28] sm:$0xff]  ;;  %v342_v54 = vld [vmem:[%s1816_s8 + $0x20] sm:$0xff]  ;;  %v341_v55 = vld [vmem:[%s1816_s8 + $0x18] sm:$0xff] }
  0x20   :  { %1022 = vmatpush3.msra.mxu0 %v59_v21  ;;  %1053 = vmatpush3.msra.mxu1 %v151_v27  ;;  %v913_v56 = vld [vmem:[%s1815_s7] ss:$0 sm:$0xff]  ;;  %v340_v61 = vld [vmem:[%s1816_s8 + $0x10] sm:$0xff]  ;;  %v339_v62 = vld [vmem:[%s1816_s8 + $0x8] sm:$0xff] }
  0x21   :  { %1023 = vmatprep.subr.mxu0 %v1361_v1  ;;  %1054 = vmatprep.subr.mxu1 %v1361_v1  ;;  %v338_v63 = vld [vmem:[%s1816_s8] sm:$0xff] }
  0x22   :  { %1024 = vmatpush3.msra.mxu0 %v58_v22  ;;  %1055 = vmatpush3.msra.mxu1 %v150_v28  ;;  %v928_v0 = vld [vmem:[%s1815_s7 + $0x1] ss:$0 sm:$0xff]  ;;  %v930_v8 = vld [vmem:[%s1817_s9] ss:$0 sm:$0xff]  ;;  %s1363_s7 = smov 120   ;;  %s1364_s9 = smov 112  }
  0x23   :  { %1025 = vmatprep.subr.mxu0 %v1361_v1  ;;  %1056 = vmatprep.subr.mxu1 %v1361_v1  ;;  %v1714_v6 = vld [vmem:[%s1833_s30] sm:$0xff] }
  0x24   :  { %1026 = vmatpush3.msra.mxu0 %v57_v23  ;;  %1057 = vmatpush3.msra.mxu1 %v149_v29  ;;  %v432_v7 = vsub.f32 1.0, %v1714_v6 }
  0x25   :  { %1027 = vmatprep.subr.mxu0 %v1361_v1  ;;  %1061 = vmatprep.subr.mxu1 %v1361_v1 }
  0x26   :  { %1028 = vmatpush3.msra.mxu0 %v56_v24  ;;  %v433_v11 = vmul.f32 1e-10, %v432_v7 }
  0x27   :  { %1029 = vmatprep.subr.mxu0 %v1361_v1 }
  0x28   :  { %1030 = vmatpush3.msra.mxu0 %v55_v25 }
  0x29   :  { %1032 = vmatmul.mubr.f32.vlgmr.msra.gmra.mxu0 %v54_v26  ;;  %1088 = vmatprep.subr.mxu0 %v1361_v1 }
  0x2a   :  { %1112 = vmatprep.mubr.msk.f32.mxu0 %vm1362_vm0, %v1361_v1  ;;  %1089 = vmatpush3.msra.mxu0 %v349_v47 }
  0x2b   :  { %1090 = vmatprep.subr.mxu0 %v1361_v1 }
  0x2c   :  { %1091 = vmatpush3.msra.mxu0 %v348_v48  ;;  %v458_v48 = vstv %s1835_s23 }
  0x2d   :  { %1092 = vmatprep.subr.mxu0 %v1361_v1 }
  0x2e   :  { %1093 = vmatpush3.msra.mxu0 %v347_v49 }
  0x2f   :  { %1094 = vmatprep.subr.mxu0 %v1361_v1 }
  0x30   :  { %1095 = vmatpush3.msra.mxu0 %v346_v50 }
  0x31   :  { %1096 = vmatprep.subr.mxu0 %v1361_v1 }
  0x32   :  { %1097 = vmatpush3.msra.mxu0 %v345_v51 }
  0x33   :  { %1098 = vmatprep.subr.mxu0 %v1361_v1 }
  0x34   :  { %1099 = vmatpush3.msra.mxu0 %v344_v52 }
  0x35   :  { %1100 = vmatprep.subr.mxu0 %v1361_v1 }
  0x36   :  { %1101 = vmatpush3.msra.mxu0 %v343_v53 }
  0x37   :  { %1102 = vmatprep.subr.mxu0 %v1361_v1 }
  0x38   :  { %1103 = vmatpush3.msra.mxu0 %v342_v54 }
  0x39   :  { %1104 = vmatprep.subr.mxu0 %v1361_v1 }
  0x3a   :  { %1105 = vmatpush3.msra.mxu0 %v341_v55 }
  0x3b   :  { %1106 = vmatprep.subr.mxu0 %v1361_v1 }
  0x3c   :  { %1107 = vmatpush3.msra.mxu0 %v340_v61 }
  0x3d   :  { %1108 = vmatprep.subr.mxu0 %v1361_v1 }
  0x3e   :  { %1109 = vmatpush3.msra.mxu0 %v339_v62 }
  0x3f   :  { %1110 = vmatprep.subr.mxu0 %v1361_v1 }
  0x40   :  { %1111 = vmatpush3.msra.mxu0 %v338_v63 }
  0x41   :  { %1125 = vmatprep.subr.mxu0 %v1361_v1 }
  0xe9   :  { %v144_v31 = vpop.f32.mrf.mxu0 }
  0xea   :  { %v145_v32 = vadd.f32 %v912_v30, %v144_v31  ;;  %v435_v30 = vld [vmem:[%s1834_s1] sm:$0xff] }
  0xeb   :  { %v1033_v33 = vpop.f32.mrf.mxu0  ;;  %v436_v31 = vadd.f32 1e-20, %v435_v30 }
  0xec   :  { %v148_v34 = vmax.f32 %v145_v32, 0.0 }
  0xee   :  { %1059 = vmatmul.mubr.msk.f32.vlgmr.msra.gmra.mxu1 %vm168_vm1, %v148_v34 }
  0xef   :  { %1062 = vmatpush3.msra.mxu1 %v926_v35  ;;  %1085 = vmatprep.mubr.msk.f32.mxu1 %vm1362_vm0, %v1361_v1 }
  0xf0   :  { %1063 = vmatprep.subr.mxu1 %v1361_v1 }
  0xf1   :  { %1064 = vmatpush3.msra.mxu1 %v925_v36 }
  0xf2   :  { %1065 = vmatprep.subr.mxu1 %v1361_v1 }
  0xf3   :  { %1066 = vmatpush3.msra.mxu1 %v924_v37 }
  0xf4   :  { %1067 = vmatprep.subr.mxu1 %v1361_v1 }
  0xf5   :  { %1068 = vmatpush3.msra.mxu1 %v923_v38 }
  0xf6   :  { %1069 = vmatprep.subr.mxu1 %v1361_v1 }
  0xf7   :  { %1070 = vmatpush3.msra.mxu1 %v922_v39 }
  0xf8   :  { %1071 = vmatprep.subr.mxu1 %v1361_v1 }
  0xf9   :  { %1072 = vmatpush3.msra.mxu1 %v921_v40 }
  0xfa   :  { %1073 = vmatprep.subr.mxu1 %v1361_v1 }
  0xfb   :  { %1074 = vmatpush3.msra.mxu1 %v920_v41 }
  0xfc   :  { %1075 = vmatprep.subr.mxu1 %v1361_v1 }
  0xfd   :  { %1076 = vmatpush3.msra.mxu1 %v919_v42 }
  0xfe   :  { %1077 = vmatprep.subr.mxu1 %v1361_v1 }
  0xff   :  { %1078 = vmatpush3.msra.mxu1 %v918_v43 }
 0x100   :  { %1079 = vmatprep.subr.mxu1 %v1361_v1 }
 0x101   :  { %1080 = vmatpush3.msra.mxu1 %v917_v44 }
 0x102   :  { %1081 = vmatprep.subr.mxu1 %v1361_v1 }
 0x103   :  { %1082 = vmatpush3.msra.mxu1 %v916_v45 }
 0x104   :  { %1083 = vmatprep.subr.mxu1 %v1361_v1 }
 0x105   :  { %1084 = vmatpush3.msra.mxu1 %v915_v46 }
 0x106   :  { %1115 = vmatprep.subr.mxu1 %v1361_v1 }
 0x1ae   :  { %v238_v57 = vpop.f32.mrf.mxu1 }
 0x1af   :  { %v239_v58 = vadd.f32 %v913_v56, %v238_v57 }
 0x1b0   :  { %v1060_v59 = vpop.f32.mrf.mxu1 }
 0x1b1   :  { %v242_v60 = vmax.f32 %v239_v58, 0.0 }
 0x1b3   :  { %1086 = vmatmul.mubr.msk.f32.vlgmr.msra.gmra.mxu1 %vm168_vm1, %v242_v60 }
 0x1b4   :  { %1117 = vmatprep.mubr.msk.f32.mxu1 %vm1362_vm0, %v1361_v1 }
 0x273   :  { %v333_v2 = vpop.f32.mrf.mxu1 }
 0x274   :  { %v334_v3 = vadd.f32 %v928_v0, %v333_v2 }
 0x275   :  { %v1087_v4 = vpop.f32.mrf.mxu1 }
 0x276   :  { %v337_v5 = vmax.f32 %v334_v3, 0.0 }
 0x278   :  { %1113 = vmatmul.mubr.msk.f32.vlgmr.msra.gmra.mxu0 %vm168_vm1, %v337_v5 }
 0x279   :  { %1127 = vmatprep.mubr.msk.f32.mxu0 %vm1362_vm0, %v1361_v1 }
 0x338   :  { %v426_v9 = vpop.f32.mrf.mxu0 }
 0x339   :  { %v427_v10 = vadd.f32 %v930_v8, %v426_v9 }
 0x33a   :  { %v1114_v12 = vpop.f32.mrf.mxu0 }
 0x33b   :  { %v431_v13 = vmul.f32 %v1714_v6, %v427_v10 }
 0x33d   :  { %v434_v14 = vadd.f32 %v433_v11, %v431_v13 }
 0x33f   :  { %v551_v15 = vsel %vm550_vm2, %v434_v14, -inf  ;;  %v671_v16 = vsel %vm670_vm3, %v434_v14, -inf  ;;  %v445_v29 = vsel %vm444_vm4, %v434_v14, -inf }
 0x340   :  { %552 = vmax.xlane.f32.xlu0 %v551_v15 }
 0x344   :  { %672 = vmax.xlane.f32.xlu0 %v671_v16 }
 0x3c9   :  { %v553_v17 = vpop.xlane.xlu0 %552 }
 0x3ca   :  { %v554_v18 = vsub.f32 %v434_v14, %v553_v17 }
 0x3cc   :  { %v555_v19 = vmul.f32 1.442695, %v554_v18 }
 0x3cd   :  { %v673_v20 = vpop.xlane.xlu0 %672 }
 0x3ce   :  { %1143 = vpow2.f32 %v555_v19  ;;  %v674_v21 = vsub.f32 %v434_v14, %v673_v20 }
 0x3d0   :  { %v675_v22 = vmul.f32 1.442695, %v674_v21  ;;  %v472_v21 = vld [vmem:[%s1818_s10] sm:$0xff] }
 0x3d1   :  { %1116 = vmatpush3.msra.mxu1 %v472_v21 }
 0x3d2   :  { %1145 = vpow2.f32 %v675_v22  ;;  %1120 = vmatprep.subr.mxu1 %v1361_v1 }
 0x3d3   :  { %1147 = vlog2.f32 %v436_v31 }
 0x3db   :  { %v1144_v23 = vpop.eup %1143 }
 0x3dc   :  { %558 = vrot.lane.b32.xlu1 %v1144_v23, %s1363_s7 }
 0x3df   :  { %v1146_v24 = vpop.eup %1145 }
 0x3e0   :  { %678 = vrot.lane.b32.xlu1 %v1146_v24, %s1364_s9  ;;  %v1148_v32 = vpop.eup %1147 }
 0x3e1   :  { %v438_v33 = vmul.f32 0.6931472, %v1148_v32 }
 0x3e3   :  { %v439_v34 = vsub.f32 0.0, %v438_v33 }
 0x3e5   :  { %v440_v35 = vadd.f32 1e-20, %v439_v34 }
 0x3e7   :  { %1149 = vlog2.f32 %v440_v35  ;;  %v933_v35 = vld [vmem:[%s1818_s10 + $0x8] sm:$0xff] }
 0x3f4   :  { %v1150_v40 = vpop.eup %1149 }
 0x3f5   :  { %v442_v42 = vmul.f32 0.6931472, %v1150_v40 }
 0x3f7   :  { %v443_v44 = vsub.f32 0.0, %v442_v42 }
 0x44e   :  { %v559_v25 = vpop.permute.xlu1 %558 }
 0x44f   :  { %v561_v26 = vsel %vm444_vm4, %v559_v25, 0.0 }
 0x450   :  { %562 = vadd.xlane.f32.xlu0 %v561_v26 }
 0x452   :  { %v679_v27 = vpop.permute.xlu1 %678 }
 0x453   :  { %v681_v28 = vsel %vm444_vm4, %v679_v27, 0.0 }
 0x454   :  { %682 = vadd.xlane.f32.xlu1 %v681_v28  ;;  %446 = vmax.xlane.f32.xlu0 %v445_v29 }
 0x4d9   :  { %v563_v36 = vpop.xlane.xlu0 %562 }
 0x4da   :  { %1151 = vrcp.f32 %v563_v36 }
 0x4dd   :  { %v683_v37 = vpop.xlane.xlu1 %682  ;;  %v447_v38 = vpop.xlane.xlu0 %446 }
 0x4de   :  { %1153 = vrcp.f32 %v683_v37  ;;  %v448_v39 = vsub.f32 %v434_v14, %v447_v38 }
 0x4e0   :  { %v449_v41 = vmul.f32 1.442695, %v448_v39 }
 0x4e2   :  { %1155 = vpow2.f32 %v449_v41 }
 0x4e7   :  { %v1152_v43 = vpop.eup %1151 }
 0x4e8   :  { %v565_v45 = vmul.f32 %v1152_v43, %v1144_v23 }
 0x4ea   :  { %v1732_v46 = vmul.f32 %v565_v45, %v1714_v6 }
 0x4eb   :  { %v1154_v47 = vpop.eup %1153 }
 0x4ec   :  { %v567_v49 = vadd.f32 %v1732_v46, %v443_v44  ;;  %v685_v50 = vmul.f32 %v1154_v47, %v1146_v24  ;;  %v935_v24 = vld [vmem:[%s1818_s10 + $0x10] sm:$0xff]  ;;  %s1365_s10 = smov [#allocation5]  }
 0x4ed   :  { %1126 = vmatpush3.msra.mxu0 %v935_v24  ;;  %s806_s27 = sshll.u32 %s1365_s10, 4  ;;  %s807_s27 = int_to_ptr.vmem [resolvable:$true] %s806_s27 }
 0x4ee   :  { %v568_v51 = vmul.f32 %v567_v49, %v458_v48  ;;  %v686_v52 = vmul.f32 %v685_v50, %v1714_v6  ;;  %s1171_s28 = scalar_lea.vmem %s807_s27, 128  ;;  %p1176_p1 = scmp.lt.s32.totalorder %s807_s27, %s807_s27 }
 0x4ef   :  { %v1156_v57 = vpop.eup %1155  ;;  %p1172_p0 = scmp.ne.s32.totalorder %s807_s27, %s1171_s28  ;;  %p1177_p2 = scmp.lt.s32.totalorder %s1171_s28, %s1171_s28 }
 0x4f0   :  { %v569_v53 = vsel %vm550_vm2, %v568_v51, -inf  ;;  %v687_v54 = vadd.f32 %v686_v52, %v443_v44  ;;  %v451_v58 = vsel %vm444_vm4, %v1156_v57, 0.0 }
 0x4f1   :  { %570 = vmax.xlane.f32.xlu0 %v569_v53  ;;  %p1178_p3 = por %p1177_p2, %p1176_p1 }
 0x4f2   :  { %v688_v55 = vmul.f32 %v687_v54, %v458_v48 }
 0x4f3   :  { %p1179_p4 = pnand %p1178_p3, %p1172_p0 }
 0x4f4   :  { %v689_v56 = vsel %vm670_vm3, %v688_v55, -inf }
 0x4f5   :  { %690 = vmax.xlane.f32.xlu0 %v689_v56 }
 0x4f9   :  { %452 = vadd.xlane.f32.xlu0 %v451_v58 }
 0x57a   :  { %v571_v59 = vpop.xlane.xlu0 %570 }
 0x57b   :  { %v572_v60 = vsub.f32 %v568_v51, %v571_v59 }
 0x57d   :  { %v573_v61 = vmul.f32 1.442695, %v572_v60 }
 0x57e   :  { %v691_v62 = vpop.xlane.xlu0 %690 }
 0x57f   :  { %1157 = vpow2.f32 %v573_v61  ;;  %v692_v63 = vsub.f32 %v688_v55, %v691_v62 }
 0x581   :  { %v693_v0 = vmul.f32 1.442695, %v692_v63 }
 0x582   :  { %v453_v2 = vpop.xlane.xlu0 %452 }
 0x583   :  { %1159 = vpow2.f32 %v693_v0 }
 0x584   :  { %1161 = vrcp.f32 %v453_v2 }
 0x58c   :  { %v1158_v3 = vpop.eup %1157 }
 0x58d   :  { %576 = vrot.lane.b32.xlu0 %v1158_v3, %s1363_s7 }
 0x590   :  { %v1160_v4 = vpop.eup %1159 }
 0x591   :  { %v1162_v5 = vpop.eup %1161  ;;  %696 = vrot.lane.b32.xlu1 %v1160_v4, %s1364_s9 }
 0x592   :  { %v455_v7 = vmul.f32 %v1162_v5, %v1156_v57 }
 0x594   :  { %v456_v8 = vmul.f32 %v455_v7, %v1714_v6 }
 0x596   :  { %546 = vst.msk [vmem:[#allocation5] sm:$0xff] %vm444_vm4, %v456_v8  ;;  %v457_v9 = vadd.f32 %v456_v8, %v443_v44 }
 0x598   :  { %v459_v10 = vmul.f32 %v458_v48, %v457_v9 }
 0x59a   :  { %v460_v11 = vsel %vm444_vm4, %v459_v10, -inf }
 0x5ac   :  { %461 = vmax.xlane.f32.xlu0 %v460_v11 }
 0x5ff   :  { %v577_v12 = vpop.permute.xlu0 %576 }
 0x600   :  { %v579_v13 = vsel %vm444_vm4, %v577_v12, 0.0 }
 0x601   :  { %580 = vadd.xlane.f32.xlu1 %v579_v13 }
 0x603   :  { %v697_v14 = vpop.permute.xlu1 %696 }
 0x604   :  { %v699_v15 = vsel %vm444_vm4, %v697_v14, 0.0 }
 0x605   :  { %700 = vadd.xlane.f32.xlu0 %v699_v15 }
 0x635   :  { %v462_v16 = vpop.xlane.xlu0 %461 }
 0x636   :  { %v463_v17 = vsub.f32 %v459_v10, %v462_v16 }
 0x638   :  { %v464_v18 = vmul.f32 1.442695, %v463_v17 }
 0x63a   :  { %1163 = vpow2.f32 %v464_v18 }
 0x647   :  { %v1164_v19 = vpop.eup %1163 }
 0x648   :  { %v466_v20 = vsel %vm444_vm4, %v1164_v19, 0.0 }
 0x649   :  { %467 = vadd.xlane.f32.xlu0 %v466_v20 }
 0x68a   :  { %v581_v22 = vpop.xlane.xlu1 %580 }
 0x68b   :  { %1165 = vrcp.f32 %v581_v22 }
 0x68e   :  { %v701_v23 = vpop.xlane.xlu0 %700 }
 0x68f   :  { %1167 = vrcp.f32 %v701_v23 }
 0x698   :  { %v1166_v25 = vpop.eup %1165 }
 0x699   :  { %v583_v26 = vmul.f32 %v1166_v25, %v1158_v3 }
 0x69b   :  { %v584_v27 = vmul.f32 %v583_v26, %v1714_v6 }
 0x69c   :  { %v1168_v28 = vpop.eup %1167 }
 0x69d   :  { %588 = vrot.lane.b32.xlu0 %v584_v27, %s1363_s7  ;;  %v703_v29 = vmul.f32 %v1168_v28, %v1160_v4 }
 0x69f   :  { %v704_v30 = vmul.f32 %v703_v29, %v1714_v6 }
 0x6a1   :  { %663 = vrot.lane.b32.xlu0 %v1732_v46, %s1363_s7  ;;  %708 = vrot.lane.b32.xlu1 %v704_v30, %s1364_s9 }
 0x6a5   :  { %783 = vrot.lane.b32.xlu1 %v686_v52, %s1364_s9 }
 0x6d2   :  { %v468_v31 = vpop.xlane.xlu0 %467 }
 0x6d3   :  { %1169 = vrcp.f32 %v468_v31 }
 0x6e0   :  { %v1170_v32 = vpop.eup %1169 }
 0x6e1   :  { %v470_v33 = vmul.f32 %v1170_v32, %v1164_v19 }
 0x6e3   :  { %v471_v34 = vmul.f32 %v470_v33, %v1714_v6 }
 0x6e5   :  { %1118 = vmatmul.mubr.msk.f32.vlgmr.msra.gmra.mxu1 %vm444_vm4, %v471_v34  ;;  %547 = vst.msk [vmem:[#allocation7] sm:$0xff] %vm444_vm4, %v471_v34 }
 0x6e6   :  { %1121 = vmatpush3.msra.mxu1 %v933_v35  ;;  %1122 = vmatprep.mubr.msk.f32.mxu1 %vm1362_vm0, %v1361_v1 }
 0x70f   :  { %v589_v36 = vpop.permute.xlu0 %588 }
 0x710   :  { %668 = vst.msk [vmem:[#allocation11] sm:$0xff] %vm444_vm4, %v589_v36  ;;  %1123 = vmatmul.mubr.msk.f32.vlgmr.msra.gmra.mxu1 %vm444_vm4, %v589_v36 }
 0x713   :  { %v709_v37 = vpop.permute.xlu1 %708  ;;  %v664_v38 = vpop.permute.xlu0 %663 }
 0x714   :  { %788 = vst.msk [vmem:[#allocation16] sm:$0xff] %vm444_vm4, %v709_v37  ;;  %666 = vst.msk [vmem:[#allocation10] sm:$0xff] %vm444_vm4, %v664_v38  ;;  %1128 = vmatmul.mubr.msk.f32.vlgmr.msra.gmra.mxu0 %vm444_vm4, %v709_v37 }
 0x717   :  { %v784_v6 = vpop.permute.xlu1 %783 }
 0x718   :  { %786 = vst.msk [vmem:[#allocation14] sm:$0xff] %vm444_vm4, %v784_v6 }
 0x719   :  { %1182 = shalt.err (!%p1179_p4)
}
 0x71a   :  { %809 = dma.vmem_to_hbm [thread:$0]  %s807_s27, 128, %s1820_s12, [#allocation6]  }
 0x71b   :  { %s1366_s30 = smov [#allocation11]   ;;  %s1367_s20 = smov [#allocation14]  }
 0x71c   :  { %s846_s8 = sshll.u32 %s1366_s30, 4  ;;  %s866_s7 = sshll.u32 %s1367_s20, 4  ;;  %s847_s8 = int_to_ptr.vmem [resolvable:$true] %s846_s8  ;;  %s867_s7 = int_to_ptr.vmem [resolvable:$true] %s866_s7 }
 0x71d   :  { %s1191_s9 = scalar_lea.vmem %s847_s8, 128  ;;  %p1196_p6 = scmp.lt.s32.totalorder %s847_s8, %s847_s8 }
 0x71e   :  { %p1192_p5 = scmp.ne.s32.totalorder %s847_s8, %s1191_s9  ;;  %p1197_p7 = scmp.lt.s32.totalorder %s1191_s9, %s1191_s9 }
 0x720   :  { %p1198_p8 = por %p1197_p7, %p1196_p6 }
 0x722   :  { %p1199_p9 = pnand %p1198_p8, %p1192_p5 }
 0x724   :  { %1202 = shalt.err (!%p1199_p9)
}
 0x725   :  { %849 = dma.vmem_to_hbm [thread:$0]  %s847_s8, 128, %s1824_s16, [#allocation12]  }
 0x726   :  { %s1211_s1 = scalar_lea.vmem %s867_s7, 128  ;;  %p1216_p11 = scmp.lt.s32.totalorder %s867_s7, %s867_s7 }
 0x727   :  { %p1212_p10 = scmp.ne.s32.totalorder %s867_s7, %s1211_s1  ;;  %p1217_p12 = scmp.lt.s32.totalorder %s1211_s1, %s1211_s1 }
 0x729   :  { %p1218_p13 = por %p1217_p12, %p1216_p11 }
 0x72b   :  { %p1219_p0 = pnand %p1218_p13, %p1212_p10 }
 0x72d   :  { %1222 = shalt.err (!%p1219_p0)
}
 0x72e   :  { %869 = dma.vmem_to_hbm [thread:$0]  %s867_s7, 128, %s1826_s18, [#allocation15]  }
 0x72f   :  { %s1368_s2 = smov [#allocation7]  }
 0x730   :  { %s816_s23 = sshll.u32 %s1368_s2, 4  ;;  %s817_s23 = int_to_ptr.vmem [resolvable:$true] %s816_s23 }
 0x731   :  { %s1231_s24 = scalar_lea.vmem %s817_s23, 128  ;;  %p1236_p2 = scmp.lt.s32.totalorder %s817_s23, %s817_s23 }
 0x732   :  { %p1232_p1 = scmp.ne.s32.totalorder %s817_s23, %s1231_s24  ;;  %p1237_p3 = scmp.lt.s32.totalorder %s1231_s24, %s1231_s24 }
 0x734   :  { %p1238_p4 = por %p1237_p3, %p1236_p2 }
 0x736   :  { %p1239_p5 = pnand %p1238_p4, %p1232_p1 }
 0x738   :  { %1242 = shalt.err (!%p1239_p5)
}
 0x739   :  { %819 = dma.vmem_to_hbm [thread:$0]  %s817_s23, 128, %s1821_s13, [#allocation6]  }
 0x73a   :  { %s1369_s4 = smov [#allocation16]  }
 0x73b   :  { %s876_s3 = sshll.u32 %s1369_s4, 4  ;;  %s877_s3 = int_to_ptr.vmem [resolvable:$true] %s876_s3 }
 0x73c   :  { %s1251_s6 = scalar_lea.vmem %s877_s3, 128  ;;  %p1256_p7 = scmp.lt.s32.totalorder %s877_s3, %s877_s3 }
 0x73d   :  { %p1252_p6 = scmp.ne.s32.totalorder %s877_s3, %s1251_s6  ;;  %p1257_p8 = scmp.lt.s32.totalorder %s1251_s6, %s1251_s6 }
 0x73f   :  { %p1258_p9 = por %p1257_p8, %p1256_p7 }
 0x741   :  { %p1259_p10 = pnand %p1258_p9, %p1252_p6 }
 0x743   :  { %1262 = shalt.err (!%p1259_p10)
}
 0x744   :  { %879 = dma.vmem_to_hbm [thread:$0]  %s877_s3, 128, %s1827_s19, [#allocation15]   ;;  %vm548_vm5 = vcmask 261120  }
 0x745   :  { %s1370_s10 = smov [#allocation3]  }
 0x746   :  { %s796_s27 = sshll.u32 %s1370_s10, 4  ;;  %s797_s27 = int_to_ptr.vmem [resolvable:$true] %s796_s27 }
 0x747   :  { %s1271_s13 = scalar_lea.vmem %s797_s27, 128  ;;  %p1276_p12 = scmp.lt.s32.totalorder %s797_s27, %s797_s27 }
 0x748   :  { %p1272_p11 = scmp.ne.s32.totalorder %s797_s27, %s1271_s13  ;;  %p1277_p13 = scmp.lt.s32.totalorder %s1271_s13, %s1271_s13 }
 0x74a   :  { %p1278_p0 = por %p1277_p13, %p1276_p12 }
 0x74c   :  { %p1279_p1 = pnand %p1278_p0, %p1272_p11 }
 0x7a5   :  { %v542_v1 = vpop.f32.mrf.mxu1 }
 0x7a6   :  { %549 = vst.msk [vmem:[#allocation3] sm:$0xff] %vm548_vm5, %v542_v1 }
 0x7a7   :  { %v1119_v39 = vpop.f32.mrf.mxu1 }
 0x7a8   :  { %1282 = shalt.err (!%p1279_p1)
}
 0x7a9   :  { %799 = dma.vmem_to_hbm [thread:$0]  %s797_s27, 128, %s1819_s11, [#allocation4]  }
 0x7aa   :  { %s1371_s19 = smov [#allocation8]   ;;  %s1372_s30 = smov [#allocation10]  }
 0x7ab   :  { %s826_s0 = sshll.u32 %s1371_s19, 4  ;;  %s836_s8 = sshll.u32 %s1372_s30, 4  ;;  %s827_s0 = int_to_ptr.vmem [resolvable:$true] %s826_s0  ;;  %s837_s8 = int_to_ptr.vmem [resolvable:$true] %s836_s8 }
 0x7ac   :  { %s1373_s20 = smov [#allocation13]   ;;  %s1291_s9 = scalar_lea.vmem %s827_s0, 128 }
 0x7ad   :  { %s856_s7 = sshll.u32 %s1373_s20, 4  ;;  %p1292_p2 = scmp.ne.s32.totalorder %s827_s0, %s1291_s9  ;;  %s857_s7 = int_to_ptr.vmem [resolvable:$true] %s856_s7 }
 0x7ae   :  { %p1296_p3 = scmp.lt.s32.totalorder %s827_s0, %s827_s0  ;;  %p1297_p4 = scmp.lt.s32.totalorder %s1291_s9, %s1291_s9 }
 0x7b0   :  { %p1298_p5 = por %p1297_p4, %p1296_p3 }
 0x7b2   :  { %p1299_p6 = pnand %p1298_p5, %p1292_p2 }
 0x7d0   :  { %v658_v40 = vpop.f32.mrf.mxu1 }
 0x7d1   :  { %669 = vst.msk [vmem:[#allocation8] sm:$0xff] %vm548_vm5, %v658_v40 }
 0x7d2   :  { %v1124_v41 = vpop.f32.mrf.mxu1 }
 0x7d3   :  { %1302 = shalt.err (!%p1299_p6)
}
 0x7d4   :  { %829 = dma.vmem_to_hbm [thread:$0]  %s827_s0, 128, %s1822_s14, [#allocation9]  }
 0x7d5   :  { %s1311_s5 = scalar_lea.vmem %s837_s8, 128  ;;  %p1316_p8 = scmp.lt.s32.totalorder %s837_s8, %s837_s8 }
 0x7d6   :  { %p1312_p7 = scmp.ne.s32.totalorder %s837_s8, %s1311_s5  ;;  %p1317_p9 = scmp.lt.s32.totalorder %s1311_s5, %s1311_s5 }
 0x7d8   :  { %p1318_p10 = por %p1317_p9, %p1316_p8 }
 0x7da   :  { %p1319_p11 = pnand %p1318_p10, %p1312_p7 }
 0x7dc   :  { %1322 = shalt.err (!%p1319_p11)
}
 0x7dd   :  { %839 = dma.vmem_to_hbm [thread:$0]  %s837_s8, 128, %s1823_s15, [#allocation9]   ;;  %v778_v42 = vpop.f32.mrf.mxu0 }
 0x7de   :  { %789 = vst.msk [vmem:[#allocation13] sm:$0xff] %vm548_vm5, %v778_v42  ;;  %s1331_s22 = scalar_lea.vmem %s857_s7, 128  ;;  %p1336_p13 = scmp.lt.s32.totalorder %s857_s7, %s857_s7 }
 0x7df   :  { %v1129_v43 = vpop.f32.mrf.mxu0  ;;  %p1332_p12 = scmp.ne.s32.totalorder %s857_s7, %s1331_s22  ;;  %p1337_p0 = scmp.lt.s32.totalorder %s1331_s22, %s1331_s22 }
 0x7e1   :  { %p1338_p1 = por %p1337_p0, %p1336_p13 }
 0x7e3   :  { %p1339_p2 = pnand %p1338_p1, %p1332_p12 }
 0x7e5   :  { %1342 = shalt.err (!%p1339_p2)
}
 0x7e6   :  { %859 = dma.vmem_to_hbm [thread:$0]  %s857_s7, 128, %s1825_s17, [#allocation12]  }
 0x7e7   :  { %1351 = dma.done.wait [#allocation4], 128  }
 0x7e8   :  { %1352 = vsyncadd [#allocation4], 4294967168 }
 0x7e9   :  { %1353 = dma.done.wait [#allocation6], 256  }
 0x7ea   :  { %1354 = vsyncadd [#allocation6], 4294967040 }
 0x7eb   :  { %1355 = dma.done.wait [#allocation9], 256  }
 0x7ec   :  { %1356 = vsyncadd [#allocation9], 4294967040 }
 0x7ed   :  { %1357 = dma.done.wait [#allocation12], 256  }
 0x7ee   :  { %1358 = vsyncadd [#allocation12], 4294967040 }
 0x7ef   :  { %1359 = dma.done.wait [#allocation15], 256  }
 0x7f0   :  { %1360 = vsyncadd [#allocation15], 4294967040 }
 0x7f1   :  { %907 = vsyncpa [#allocation4], 1 }
 0x7f2   :  { %908 = vsyncpa [#allocation6], 1 }
 0x7f3   :  { %909 = vsyncpa [#allocation9], 1 }
 0x7f4   :  { %910 = vsyncpa [#allocation12], 1 }
 0x7f5   :  { %911 = vsyncpa [#allocation15], 1 }

</bundles_post_ra>
